<compile_context>
chip_gen: v5e
topology: v5e:2x2
jax: 0.10.0
libtpu: 0.0.40
codegen_flags: <defaults>
</compile_context>

<pallas_src>
import functools

import jax
import jax.numpy as jnp
from jax.experimental import pallas as pl
from jax.experimental.pallas import tpu as pltpu

_LANES = 128
_MAX_TILE_ROWS = 1024   # (1024,128) f32 = 512 KiB / input / pipeline buffer
_NUM_CORES = 2          # leading "parallel" axis (2 TCs on v7x; no-op on 1-TC chips)


def _charbonnier_partial_sum_kernel(
    x_ref, y_ref, out_ref, acc_ref, *, eps, rows, tile_rows, steps, need_mask
):
    c = pl.program_id(0)   # parallel (core) axis
    j = pl.program_id(1)   # sequential reduction axis

    @pl.when(j == 0)
    def _():
        acc_ref[...] = jnp.zeros_like(acc_ref)

    diff = x_ref[...].astype(jnp.float32) - y_ref[...].astype(jnp.float32)
    val = jnp.sqrt(diff * diff + jnp.float32(eps * eps))

    if need_mask:
        # Logical (unclamped) block index; the index_map clamps the actual DMA
        # so out-of-range iterations reload a valid block, and we zero it here.
        blk = c * steps + j
        valid_rows = rows - blk * tile_rows           # <= 0 => fully masked
        row_idx = jax.lax.broadcasted_iota(jnp.int32, val.shape, 0)
        val = jnp.where(row_idx < valid_rows, val, 0.0)

    # Pure element-wise accumulation every step (hides under the input DMA).
    acc_ref[...] += val

    @pl.when(j == pl.num_programs(1) - 1)
    def _():
        out_ref[...] = jnp.sum(acc_ref[...]).reshape(1, 1, 1)


def charbonnier_loss(x, y, eps=1e-3):
    """Pallas implementation of CharbonnierLoss.forward(x, y)."""
    assert x.shape == y.shape, "x and y must have the same shape"
    n = x.size

    xf = x.reshape(-1)
    yf = y.reshape(-1)

    eps_sq = jnp.float32(eps * eps)

    # Sub-128 tail handled directly in the wrapper (avoids any padding copy).
    n128 = (n // _LANES) * _LANES
    tail_sum = jnp.float32(0.0)
    if n128 < n:
        dt = xf[n128:].astype(jnp.float32) - yf[n128:].astype(jnp.float32)
        tail_sum = jnp.sum(jnp.sqrt(dt * dt + eps_sq))

    if n128 == 0:
        # Fewer than 128 elements: nothing for the kernel to do.
        return tail_sum / jnp.float32(n)

    rows = n128 // _LANES
    if n128 < n:
        x2 = xf[:n128].reshape(rows, _LANES)
        y2 = yf[:n128].reshape(rows, _LANES)
    else:  # common case: pure (free) reshape, no copy
        x2 = xf.reshape(rows, _LANES)
        y2 = yf.reshape(rows, _LANES)

    # Big streaming tiles; full-extent block for small inputs.
    tile_rows = rows if rows <= _MAX_TILE_ROWS else _MAX_TILE_ROWS
    num_blocks = pl.cdiv(rows, tile_rows)
    num_cores = _NUM_CORES if num_blocks >= _NUM_CORES else 1
    steps = pl.cdiv(num_blocks, num_cores)
    need_mask = (rows % tile_rows != 0) or (num_cores * steps != num_blocks)

    def in_idx_map(c, j):
        # Clamp so out-of-range (fully masked) iterations still DMA in-bounds.
        return (jnp.minimum(c * steps + j, num_blocks - 1), 0)

    kernel = functools.partial(
        _charbonnier_partial_sum_kernel,
        eps=float(eps),
        rows=rows,
        tile_rows=tile_rows,
        steps=steps,
        need_mask=need_mask,
    )

    partial_sums = pl.pallas_call(
        kernel,
        out_shape=jax.ShapeDtypeStruct((num_cores, 1, 1), jnp.float32),
        grid_spec=pltpu.PrefetchScalarGridSpec(
            num_scalar_prefetch=0,
            grid=(num_cores, steps),
            in_specs=[
                pl.BlockSpec((tile_rows, _LANES), in_idx_map),
                pl.BlockSpec((tile_rows, _LANES), in_idx_map),
            ],
            out_specs=pl.BlockSpec((1, 1, 1), lambda c, j: (c, 0, 0)),
            scratch_shapes=[pltpu.VMEM((tile_rows, _LANES), jnp.float32)],
        ),
        compiler_params=pltpu.CompilerParams(
            dimension_semantics=("parallel", "arbitrary"),
        ),
    )(x2, y2)

    total = jnp.sum(partial_sums) + tail_sum
    return total / jnp.float32(n)


def charbonnier_loss_ref(x, y, eps=1e-3):
    diff = x.astype(jnp.float32) - y.astype(jnp.float32)
    return jnp.mean(jnp.sqrt(diff * diff + eps * eps))


def _check(shape, key):
    kx, ky = jax.random.split(key)
    x = jax.random.normal(kx, shape, dtype=jnp.float32)
    y = jax.random.normal(ky, shape, dtype=jnp.float32)
    out = jax.block_until_ready(charbonnier_loss(x, y))
    ref = charbonnier_loss_ref(x, y)
    assert jnp.allclose(out, ref, rtol=1e-5, atol=1e-6), (shape, out, ref)


if __name__ == "__main__":
    key = jax.random.PRNGKey(0)
    k0, k1, k2 = jax.random.split(key, 3)

    # NCHW, as the PyTorch module would receive (restored vs. GT image).
    _check((2, 4, 16, 16), k0)      # clean multiple of 128, single block
    _check((3, 3, 17, 19), k1)      # exercises the sub-128 tail path
    _check((2, 4, 132, 132), k2)    # exercises masking + both-core partition

    print("KERNEL_OK")
</pallas_src>

<mosaic_0001>
module attributes {stable_mosaic.version = 11 : i64} {
  func.func @_charbonnier_partial_sum_kernel(%arg0: i32, %arg1: i32, %arg2: memref<16x128xf32, #tpu.memory_space<vmem>>, %arg3: memref<16x128xf32, #tpu.memory_space<vmem>>, %arg4: memref<1x1x1xf32, #tpu.memory_space<vmem>>, %arg5: memref<16x128xf32, #tpu.memory_space<vmem>>) attributes {dimension_semantics = [#tpu.dimension_semantics<parallel>, #tpu.dimension_semantics<arbitrary>], iteration_bounds = array<i64: 1, 1>, scalar_prefetch = 0 : i64, scratch_operands = 1 : i64, tpu.core_type = #tpu.core_type<tc>, window_params = [{transform_indices = @transform_0, window_bounds = array<i64: 16, 128>}, {transform_indices = @transform_1, window_bounds = array<i64: 16, 128>}, {transform_indices = @transform_2, window_bounds = array<i64: 1, 1, 1>}]} {
    %c0_i32 = arith.constant 0 : i32
    %0 = arith.cmpi eq, %arg1, %c0_i32 : i32
    %1 = arith.extui %0 : i1 to i32
    %c0_i32_0 = arith.constant 0 : i32
    %2 = arith.cmpi ne, %1, %c0_i32_0 : i32
    scf.if %2 {
      %cst_10 = arith.constant 0.000000e+00 : f32
      %16 = vector.broadcast %cst_10 : f32 to vector<16x128xf32>
      %c0_11 = arith.constant 0 : index
      %c0_12 = arith.constant 0 : index
      %17 = vector.load %arg5[%c0_11, %c0_12] : memref<16x128xf32, #tpu.memory_space<vmem>>, vector<16x128xf32>
      tpu.vector_store %arg5[%c0_11, %c0_12], %16 {strides = array<i32>} : memref<16x128xf32, #tpu.memory_space<vmem>>, vector<16x128xf32>,
    } else {
    }
    %c0 = arith.constant 0 : index
    %c0_1 = arith.constant 0 : index
    %3 = vector.load %arg2[%c0, %c0_1] : memref<16x128xf32, #tpu.memory_space<vmem>>, vector<16x128xf32>
    %c0_2 = arith.constant 0 : index
    %c0_3 = arith.constant 0 : index
    %4 = vector.load %arg3[%c0_2, %c0_3] : memref<16x128xf32, #tpu.memory_space<vmem>>, vector<16x128xf32>
    %5 = arith.subf %3, %4 : vector<16x128xf32>
    %6 = arith.mulf %5, %5 : vector<16x128xf32>
    %cst = arith.constant 9.99999997E-7 : f32
    %7 = vector.broadcast %cst : f32 to vector<16x128xf32>
    %8 = arith.addf %6, %7 : vector<16x128xf32>
    %9 = math.sqrt %8 : vector<16x128xf32>
    %c0_4 = arith.constant 0 : index
    %c0_5 = arith.constant 0 : index
    %10 = vector.load %arg5[%c0_4, %c0_5] : memref<16x128xf32, #tpu.memory_space<vmem>>, vector<16x128xf32>
    %11 = arith.addf %10, %9 : vector<16x128xf32>
    %c0_6 = arith.constant 0 : index
    %c0_7 = arith.constant 0 : index
    %12 = vector.load %arg5[%c0_6, %c0_7] : memref<16x128xf32, #tpu.memory_space<vmem>>, vector<16x128xf32>
    tpu.vector_store %arg5[%c0_6, %c0_7], %11 {strides = array<i32>} : memref<16x128xf32, #tpu.memory_space<vmem>>, vector<16x128xf32>,
    %c0_i32_8 = arith.constant 0 : i32
    %13 = arith.cmpi eq, %arg1, %c0_i32_8 : i32
    %14 = arith.extui %13 : i1 to i32
    %c0_i32_9 = arith.constant 0 : i32
    %15 = arith.cmpi ne, %14, %c0_i32_9 : i32
    scf.if %15 {
      %c0_10 = arith.constant 0 : index
      %c0_11 = arith.constant 0 : index
      %16 = vector.load %arg5[%c0_10, %c0_11] : memref<16x128xf32, #tpu.memory_space<vmem>>, vector<16x128xf32>
      %17 = vector.shape_cast %16 : vector<16x128xf32> to vector<1x16x128xf32>
      %cst_12 = arith.constant dense<0.000000e+00> : vector<1xf32>
      %18 = vector.multi_reduction <add>, %17, %cst_12 [1, 2] : vector<1x16x128xf32> to vector<1xf32>
      %19 = vector.shape_cast %18 : vector<1xf32> to vector<1x1x1xf32>
      %20 = vector.extract %19[0, 0, 0] : f32 from vector<1x1x1xf32>
      %21 = vector.broadcast %20 : f32 to vector<1x1x1xf32>
      %c0_13 = arith.constant 0 : index
      %c0_14 = arith.constant 0 : index
      %c0_15 = arith.constant 0 : index
      %22 = vector.load %arg4[%c0_13, %c0_14, %c0_15] : memref<1x1x1xf32, #tpu.memory_space<vmem>>, vector<1x1x1xf32>
      tpu.vector_store %arg4[%c0_13, %c0_14, %c0_15], %21 {strides = array<i32>} : memref<1x1x1xf32, #tpu.memory_space<vmem>>, vector<1x1x1xf32>,
    } else {
    }
    return
  }
  func.func @transform_0(%arg0: i32, %arg1: i32) -> (i32, i32) {
    %c1_i32 = arith.constant 1 : i32
    %0 = arith.muli %arg0, %c1_i32 : i32
    %1 = arith.addi %0, %arg1 : i32
    %c0_i32 = arith.constant 0 : i32
    %2 = arith.minsi %1, %c0_i32 : i32
    %c0_i32_0 = arith.constant 0 : i32
    %c0_i32_1 = arith.constant 0 : i32
    return %2, %c0_i32_0 : i32, i32
  }
  func.func @transform_1(%arg0: i32, %arg1: i32) -> (i32, i32) {
    %c1_i32 = arith.constant 1 : i32
    %0 = arith.muli %arg0, %c1_i32 : i32
    %1 = arith.addi %0, %arg1 : i32
    %c0_i32 = arith.constant 0 : i32
    %2 = arith.minsi %1, %c0_i32 : i32
    %c0_i32_0 = arith.constant 0 : i32
    %c0_i32_1 = arith.constant 0 : i32
    return %2, %c0_i32_0 : i32, i32
  }
  func.func @transform_2(%arg0: i32, %arg1: i32) -> (i32, i32, i32) {
    %c0_i32 = arith.constant 0 : i32
    %c0_i32_0 = arith.constant 0 : i32
    %c0_i32_1 = arith.constant 0 : i32
    return %arg0, %c0_i32, %c0_i32_0 : i32, i32, i32
  }
}

</mosaic_0001>

<bundles_post_ra>
// kernel: tpu_custom_call.1
= control target key start
LH: loop header
LB: loop body
LE: loop exit
PB: predicated region body
PF: predicated region fallthrough
CT: control target
= control target key end

     0   :  { %7 = vsyncpa [#allocation4], 0  ;;  %s268_s0 = inlined_call_operand.hbm [shape: f32[16,128], index: 0, kind: input, shape index: {}]   ;;  %s269_s1 = inlined_call_operand.hbm [shape: f32[16,128], index: 1, kind: input, shape index: {}]   ;;  %s270_s2 = inlined_call_operand.hbm [shape: f32[1,1,1], index: 2, kind: output, shape index: {}]  }
   0x1   :  { %8 = vsyncpa [#allocation7], 0 }
   0x2   :  { %9 = vsyncpa [#allocation5], 0  ;;  %s20_s11 = sshll.u32 %s268_s0, 4  ;;  %s239_s12 = smov [#allocation3]   ;;  %s21_s11 = int_to_ptr.hbm [resolvable:$true] %s20_s11 }
   0x3   :  { %s22_s13 = sshll.u32 %s239_s12, 4  ;;  %s39_s16 = sshll.u32 %s269_s1, 4  ;;  %s23_s13 = int_to_ptr.vmem [resolvable:$true] %s22_s13  ;;  %s40_s16 = int_to_ptr.hbm [resolvable:$true] %s39_s16 }
   0x4   :  { %s240_s17 = smov 128   ;;  %s241_s18 = smov 8  }
   0x5   :  { %28 = dma.hbm_to_vmem [thread:$0]  %s21_s11, 256, %s23_s13, [#allocation4], %s240_s17, %s240_s17, %s241_s18  }
   0x6   :  { %s242_s19 = smov [#allocation6]  }
   0x7   :  { %s41_s20 = sshll.u32 %s242_s19, 4  ;;  %s42_s20 = int_to_ptr.vmem [resolvable:$true] %s41_s20 }
   0x8   :  { %47 = dma.hbm_to_vmem [thread:$0]  %s40_s16, 256, %s42_s20, [#allocation7], %s240_s17, %s240_s17, %s241_s18  }
   0x9   :  { %233 = dma.done.wait [#allocation4], 256  }
   0xa   :  { %234 = vsyncadd [#allocation4], 4294967040 }
   0xb   :  { %235 = dma.done.wait [#allocation7], 256  }
   0xc   :  { %236 = vsyncadd [#allocation7], 4294967040  ;;  %v70_v0 = vld [vmem:[#allocation3] sm:$0xff]  ;;  %v71_v1 = vld [vmem:[#allocation3 + $0x8] sm:$0xff]  ;;  %s243_s0 = smov [#allocation8]   ;;  %s135_s23 = sshll.u32 %s270_s2, 4  ;;  %s136_s23 = int_to_ptr.hbm [resolvable:$true] %s135_s23 }
   0xd   :  { %v72_v2 = vld [vmem:[#allocation6] sm:$0xff]  ;;  %v73_v3 = vld [vmem:[#allocation6 + $0x8] sm:$0xff]  ;;  %s133_s1 = sshll.u32 %s243_s0, 4  ;;  %vm126_vm4 = vcmask 0   ;;  %s134_s1 = int_to_ptr.vmem [resolvable:$true] %s133_s1 }
   0xe   :  { %v74_v4 = vsub.f32 %v70_v0, %v72_v2  ;;  %v75_v5 = vsub.f32 %v71_v1, %v73_v3 }
  0x10   :  { %v76_v6 = vmul.f32 %v74_v4, %v74_v4  ;;  %v77_v7 = vmul.f32 %v75_v5, %v75_v5 }
  0x12   :  { %v78_v8 = vadd.f32 1e-06, %v76_v6  ;;  %v79_v9 = vadd.f32 1e-06, %v77_v7 }
  0x14   :  { %157 = vrsqrt.f32 %v78_v8  ;;  %vm87_vm0 = vcmp.eq.f32.partialorder %v78_v8, inf  ;;  %v90_v21 = vand.u32 2147483648, %v78_v8  ;;  %vm89_vm1 = vcmp.eq.f32.partialorder %v78_v8, 0.0 }
  0x15   :  { %159 = vrsqrt.f32 %v79_v9  ;;  %vm99_vm2 = vcmp.eq.f32.partialorder %v79_v9, inf  ;;  %v102_v24 = vand.u32 2147483648, %v79_v9  ;;  %vm101_vm3 = vcmp.eq.f32.partialorder %v79_v9, 0.0 }
  0x1a   :  { %v158_v10 = vpop.eup %157 }
  0x1b   :  { %v160_v11 = vpop.eup %159  ;;  %v81_v12 = vmul.f32 %v158_v10, %v78_v8 }
  0x1c   :  { %v93_v13 = vmul.f32 %v160_v11, %v79_v9 }
  0x1d   :  { %v82_v14 = vmul.f32 %v158_v10, %v81_v12 }
  0x1e   :  { %v94_v15 = vmul.f32 %v160_v11, %v93_v13 }
  0x1f   :  { %v83_v16 = vmul.f32 0.5, %v82_v14 }
  0x20   :  { %v95_v17 = vmul.f32 0.5, %v94_v15 }
  0x21   :  { %v84_v18 = vsub.f32 1.5, %v83_v16 }
  0x22   :  { %v96_v19 = vsub.f32 1.5, %v95_v17 }
  0x23   :  { %v85_v20 = vmul.f32 %v158_v10, %v84_v18 }
  0x24   :  { %v97_v22 = vmul.f32 %v160_v11, %v96_v19 }
  0x25   :  { %v86_v23 = vmul.f32 %v85_v20, %v78_v8 }
  0x26   :  { %v98_v25 = vmul.f32 %v97_v22, %v79_v9 }
  0x27   :  { %v88_v26 = vsel %vm87_vm0, %v78_v8, %v86_v23 }
  0x28   :  { %v91_v27 = vsel %vm89_vm1, %v90_v21, %v88_v26  ;;  %v100_v28 = vsel %vm99_vm2, %v79_v9, %v98_v25 }
  0x29   :  { %v103_v29 = vsel %vm101_vm3, %v102_v24, %v100_v28 }
  0x2a   :  { %v115_v30 = vadd.f32 %v103_v29, %v91_v27 }
  0x2c   :  { %116 = vadd.xlane.f32.xlu0 %v115_v30 }
  0x9f   :  { %v117_v31 = vpop.xlane.xlu0 %116 }
  0xa0   :  { %v118_v32 = vrot.slane %v117_v31, 4 }
  0xa2   :  { %v119_v33 = vadd.f32 %v118_v32, %v117_v31 }
  0xa4   :  { %v120_v34 = vrot.slane %v119_v33, 2 }
  0xa6   :  { %v121_v35 = vadd.f32 %v120_v34, %v119_v33 }
  0xa8   :  { %v122_v36 = vrot.slane %v121_v35, 1 }
  0xaa   :  { %v123_v37 = vadd.f32 %v122_v36, %v121_v35 }
  0xac   :  { %150 = vpush %v123_v37 }
  0xdd   :  { %s151_s24 = spop %150 }
  0xde   :  { %v125_v38 = vstv %s151_s24 }
  0xdf   :  { %127 = vst.msk [vmem:[#allocation8] sm:$0x1] %vm126_vm4, %v125_v38 }
  0xe0   :  { %138 = dma.vmem_to_hbm [thread:$0]  %s134_s1, 16, %s136_s23, [#allocation5]  }
  0xe1   :  { %237 = dma.done.wait [#allocation5], 16  }
  0xe2   :  { %238 = vsyncadd [#allocation5], 4294967280 }
  0xe3   :  { %143 = vsyncpa [#allocation4], 1 }
  0xe4   :  { %144 = vsyncpa [#allocation7], 1 }
  0xe5   :  { %145 = vsyncpa [#allocation5], 1 }

</bundles_post_ra>
